<compile_context>
chip_gen: v7x
topology: tpu7x:2x2x1
jax: 0.10.0
libtpu: 0.0.40
codegen_flags: <defaults>
</compile_context>

<pallas_src>
import jax
import jax.numpy as jnp
from jax.experimental import pallas as pl
from jax.experimental.pallas import tpu as pltpu


def _round_up(v, m):
    return ((v + m - 1) // m) * m


def lora_kernel(x_ref, wt_ref, b_ref, bt_ref, at_ref, o_ref, acc_ref, t_ref):
    # Grid: (i over M tiles [parallel], j over OUT tiles, k over IN tiles [reduction]).
    j = pl.program_id(1)
    k = pl.program_id(2)
    nk = pl.num_programs(2)

    @pl.when(k == 0)
    def _():
        acc_ref[...] = jnp.zeros_like(acc_ref)

    @pl.when(jnp.logical_and(j == 0, k == 0))
    def _():
        t_ref[...] = jnp.zeros_like(t_ref)

    x = x_ref[...]

    # Main (frozen) linear: accumulate x_k @ W.T_k in f32.
    acc_ref[...] += jnp.dot(x, wt_ref[...], preferred_element_type=jnp.float32)

    # x @ lora_B.T depends only on (i, k): compute it once per M tile (j == 0)
    # and keep it resident in scratch for the remaining OUT tiles.
    @pl.when(j == 0)
    def _():
        t_ref[...] += jnp.dot(x, bt_ref[...], preferred_element_type=jnp.float32)

    # Finalize this (i, j) output tile on the last reduction step.
    @pl.when(k == nk - 1)
    def _():
        lora = jnp.dot(t_ref[...].astype(at_ref.dtype), at_ref[...],
                       preferred_element_type=jnp.float32)
        o_ref[...] = (acc_ref[...] + b_ref[...] + lora).astype(o_ref.dtype)


def lora_linear(x, w, b, lora_a, lora_b, *, alpha=1.0,
                tm=256, tn=256, tk=512, compute_dtype=None):
    """LoRALayer forward.

    x: (M, IN), w: (OUT, IN), b: (OUT,), lora_a: (OUT, rank), lora_b: (rank, IN).
    compute_dtype: optional MXU operand dtype (e.g. jnp.bfloat16 on v6e/v7x);
    accumulation is always f32 and the output keeps x.dtype.
    """
    M, IN = x.shape
    OUT, _ = w.shape
    rank = lora_a.shape[1]
    out_dtype = x.dtype
    cdt = jnp.dtype(compute_dtype) if compute_dtype is not None else jnp.dtype(x.dtype)

    # Sublane packing: 8 rows/vreg for 4-byte dtypes, 16 for 2-byte (bf16).
    sub = 8 if cdt.itemsize >= 4 else 16

    # Effective tiles, clamped to the (padded) problem so tiny demos don't over-pad.
    tm_eff = min(tm, _round_up(M, sub))
    tn_eff = min(tn, _round_up(OUT, 128))
    tk_eff = min(tk, _round_up(IN, 128))

    Mp = _round_up(M, tm_eff)
    Np = _round_up(OUT, tn_eff)   # lane-dense (multiple of 128) output stores
    Kp = _round_up(IN, tk_eff)

    scale = float(alpha) / float(rank)

    # Layout prep (plain JAX): pre-transpose so every in-kernel matmul is
    # (.., K) @ (K, N) lane-dense, zero-pad to tile multiples, and fold `scale`
    # into A.T so the kernel epilogue is a single add.
    xp = jnp.zeros((Mp, Kp), cdt).at[:M, :IN].set(x.astype(cdt))
    wt = jnp.zeros((Kp, Np), cdt).at[:IN, :OUT].set(jnp.asarray(w).T.astype(cdt))
    bt = jnp.zeros((Kp, rank), cdt).at[:IN, :].set(jnp.asarray(lora_b).T.astype(cdt))
    at = jnp.zeros((rank, Np), cdt).at[:, :OUT].set(
        (scale * jnp.asarray(lora_a, jnp.float32).T).astype(cdt))
    b2 = jnp.zeros((1, Np), jnp.float32).at[0, :OUT].set(jnp.asarray(b, jnp.float32))

    grid = (Mp // tm_eff, Np // tn_eff, Kp // tk_eff)

    # Scoped-VMEM budget: 2x double-buffered inputs + 2x output + scratch + headroom.
    isz = cdt.itemsize
    osz = jnp.dtype(out_dtype).itemsize
    in_block_bytes = (tm_eff * tk_eff * isz       # x tile
                      + tk_eff * tn_eff * isz     # W.T tile
                      + tn_eff * 4                # bias tile
                      + tk_eff * rank * isz       # lora_B.T tile
                      + rank * tn_eff * isz)      # scaled lora_A.T tile
    out_block_bytes = tm_eff * tn_eff * osz
    scratch_bytes = tm_eff * tn_eff * 4 + tm_eff * rank * 4
    need = 2 * in_block_bytes + 2 * out_block_bytes + scratch_bytes + (4 << 20)
    vmem_limit = int(min(max(need, 32 << 20), 128 << 20))

    out_padded = pl.pallas_call(
        lora_kernel,
        out_shape=jax.ShapeDtypeStruct((Mp, Np), out_dtype),
        grid_spec=pltpu.PrefetchScalarGridSpec(
            num_scalar_prefetch=0,
            grid=grid,
            in_specs=[
                pl.BlockSpec((tm_eff, tk_eff), lambda i, j, k: (i, k)),   # x
                pl.BlockSpec((tk_eff, tn_eff), lambda i, j, k: (k, j)),   # W.T
                pl.BlockSpec((1, tn_eff),      lambda i, j, k: (0, j)),   # bias (f32)
                pl.BlockSpec((tk_eff, rank),   lambda i, j, k: (k, 0)),   # lora_B.T
                pl.BlockSpec((rank, tn_eff),   lambda i, j, k: (0, j)),   # scale*lora_A.T
            ],
            out_specs=pl.BlockSpec((tm_eff, tn_eff), lambda i, j, k: (i, j)),
            scratch_shapes=[
                pltpu.VMEM((tm_eff, tn_eff), jnp.float32),   # main accumulator
                pltpu.VMEM((tm_eff, rank), jnp.float32),     # x @ lora_B.T accumulator
            ],
        ),
        compiler_params=pltpu.CompilerParams(
            # j stays "arbitrary" because the x@B.T scratch is carried across OUT
            # tiles; M tiles provide megacore parallelism (v7x 2-TC sharding).
            dimension_semantics=("parallel", "arbitrary", "arbitrary"),
            vmem_limit_bytes=vmem_limit,
        ),
    )(xp, wt, b2, bt, at)

    return out_padded[:M, :OUT]


def lora_reference(x, w, b, lora_a, lora_b, alpha):
    rank = lora_a.shape[1]
    return x @ w.T + b + (alpha / rank) * ((x @ lora_b.T) @ lora_a.T)


if __name__ == "__main__":
    RANK = 4

    # --- Test 1: module-faithful init (lora_B = zeros), tiny shapes. ---
    M, IN, OUT, ALPHA = 8, 32, 32, 1.0
    k1, k2, k3, k4 = jax.random.split(jax.random.PRNGKey(0), 4)
    x = jax.random.normal(k1, (M, IN), jnp.float32)
    w = jax.random.normal(k2, (OUT, IN), jnp.float32) * 0.05     # Linear.weight (frozen)
    b = jax.random.normal(k3, (OUT,), jnp.float32) * 0.01        # Linear.bias   (frozen)
    lora_a = jax.random.normal(k4, (OUT, RANK), jnp.float32) / RANK  # randn(out, rank)/rank
    lora_b = jnp.zeros((RANK, IN), jnp.float32)                      # zeros(rank, in)

    y = jax.block_until_ready(lora_linear(x, w, b, lora_a, lora_b, alpha=ALPHA))
    ref = lora_reference(x, w, b, lora_a, lora_b, ALPHA)
    assert y.shape == (M, OUT)
    assert jnp.allclose(y, ref, atol=1e-5, rtol=1e-5)

    # --- Test 2: nonzero lora_B + ragged shapes + multi-tile grid (exercises the
    #     K accumulation, the OUT tiling, the x@B.T carry across OUT tiles, and
    #     the M/OUT/IN padding path).  Small explicit tiles -> grid = (3, 2, 3).
    M2, IN2, OUT2, ALPHA2 = 20, 300, 200, 2.0
    k5, k6, k7, k8, k9 = jax.random.split(jax.random.PRNGKey(1), 5)
    x2 = jax.random.normal(k5, (M2, IN2), jnp.float32)
    w2 = jax.random.normal(k6, (OUT2, IN2), jnp.float32) * 0.05
    b2 = jax.random.normal(k7, (OUT2,), jnp.float32) * 0.01
    la2 = jax.random.normal(k8, (OUT2, RANK), jnp.float32) / RANK
    lb2 = jax.random.normal(k9, (RANK, IN2), jnp.float32) * 0.1

    y2 = jax.block_until_ready(
        lora_linear(x2, w2, b2, la2, lb2, alpha=ALPHA2, tm=8, tn=128, tk=128))
    ref2 = lora_reference(x2, w2, b2, la2, lb2, ALPHA2)
    assert y2.shape == (M2, OUT2)
    # Looser tolerance: TPU default matmul precision rounds f32 operands through the
    # MXU, and the kernel's chunked K accumulation differs in order from XLA's.
    assert jnp.allclose(y2, ref2, atol=2e-3, rtol=2e-3)

    # --- Test 3: bf16 operands with f32 accumulation (v6e/v7x fast path). ---
    y3 = jax.block_until_ready(
        lora_linear(x2, w2, b2, la2, lb2, alpha=ALPHA2, tm=16, tn=128, tk=128,
                    compute_dtype=jnp.bfloat16))

    def _bf(v):
        return v.astype(jnp.bfloat16).astype(jnp.float32)

    t_ref3 = _bf(_bf(x2) @ _bf(lb2.T))
    ref3 = _bf(x2) @ _bf(w2.T) + b2 + t_ref3 @ _bf((ALPHA2 / RANK) * la2.T)
    assert y3.shape == (M2, OUT2)
    assert jnp.allclose(y3.astype(jnp.float32), ref3, atol=1e-2, rtol=1e-2)

    print("KERNEL_OK")
</pallas_src>

<mosaic_0001>
module attributes {stable_mosaic.version = 11 : i64} {
  func.func @lora_kernel(%arg0: i32, %arg1: i32, %arg2: i32, %arg3: memref<8x128xf32, #tpu.memory_space<vmem>>, %arg4: memref<128x128xf32, #tpu.memory_space<vmem>>, %arg5: memref<1x128xf32, #tpu.memory_space<vmem>>, %arg6: memref<128x4xf32, #tpu.memory_space<vmem>>, %arg7: memref<4x128xf32, #tpu.memory_space<vmem>>, %arg8: memref<8x128xf32, #tpu.memory_space<vmem>>, %arg9: memref<8x128xf32, #tpu.memory_space<vmem>>, %arg10: memref<8x4xf32, #tpu.memory_space<vmem>>) attributes {dimension_semantics = [#tpu.dimension_semantics<parallel>, #tpu.dimension_semantics<arbitrary>, #tpu.dimension_semantics<arbitrary>], iteration_bounds = array<i64: 1, 1, 1>, scalar_prefetch = 0 : i64, scratch_operands = 2 : i64, tpu.core_type = #tpu.core_type<tc>, window_params = [{transform_indices = @transform_0, window_bounds = array<i64: 8, 128>}, {transform_indices = @transform_1, window_bounds = array<i64: 128, 128>}, {transform_indices = @transform_2, window_bounds = array<i64: 1, 128>}, {transform_indices = @transform_3, window_bounds = array<i64: 128, 4>}, {transform_indices = @transform_4, window_bounds = array<i64: 4, 128>}, {transform_indices = @transform_5, window_bounds = array<i64: 8, 128>}]} {
    %c0_i32 = arith.constant 0 : i32
    %0 = arith.cmpi eq, %arg2, %c0_i32 : i32
    %1 = arith.extui %0 : i1 to i32
    %c0_i32_0 = arith.constant 0 : i32
    %2 = arith.cmpi ne, %1, %c0_i32_0 : i32
    scf.if %2 {
      %cst_15 = arith.constant 0.000000e+00 : f32
      %20 = vector.broadcast %cst_15 : f32 to vector<8x128xf32>
      %c0_16 = arith.constant 0 : index
      %c0_17 = arith.constant 0 : index
      %21 = vector.load %arg9[%c0_16, %c0_17] : memref<8x128xf32, #tpu.memory_space<vmem>>, vector<8x128xf32>
      tpu.vector_store %arg9[%c0_16, %c0_17], %20 {strides = array<i32>} : memref<8x128xf32, #tpu.memory_space<vmem>>, vector<8x128xf32>,
    } else {
    }
    %c0_i32_1 = arith.constant 0 : i32
    %3 = arith.cmpi eq, %arg1, %c0_i32_1 : i32
    %c0_i32_2 = arith.constant 0 : i32
    %4 = arith.cmpi eq, %arg2, %c0_i32_2 : i32
    %5 = arith.andi %3, %4 : i1
    %6 = arith.extui %5 : i1 to i32
    %c0_i32_3 = arith.constant 0 : i32
    %7 = arith.cmpi ne, %6, %c0_i32_3 : i32
    scf.if %7 {
      %cst_15 = arith.constant 0.000000e+00 : f32
      %20 = vector.broadcast %cst_15 : f32 to vector<8x4xf32>
      %c0_16 = arith.constant 0 : index
      %c0_17 = arith.constant 0 : index
      %21 = vector.load %arg10[%c0_16, %c0_17] : memref<8x4xf32, #tpu.memory_space<vmem>>, vector<8x4xf32>
      tpu.vector_store %arg10[%c0_16, %c0_17], %20 {strides = array<i32>} : memref<8x4xf32, #tpu.memory_space<vmem>>, vector<8x4xf32>,
    } else {
    }
    %c0 = arith.constant 0 : index
    %c0_4 = arith.constant 0 : index
    %8 = vector.load %arg3[%c0, %c0_4] : memref<8x128xf32, #tpu.memory_space<vmem>>, vector<8x128xf32>
    %c0_5 = arith.constant 0 : index
    %c0_6 = arith.constant 0 : index
    %9 = vector.load %arg9[%c0_5, %c0_6] : memref<8x128xf32, #tpu.memory_space<vmem>>, vector<8x128xf32>
    %c0_7 = arith.constant 0 : index
    %c0_8 = arith.constant 0 : index
    %10 = vector.load %arg4[%c0_7, %c0_8] : memref<128x128xf32, #tpu.memory_space<vmem>>, vector<128x128xf32>
    %cst = arith.constant dense<0.000000e+00> : vector<8x128xf32>
    %11 = tpu.matmul %8, %10, %cst {dimension_numbers = #tpu.dot_dimension_numbers<[1], [0], [0], [1], [0, 0, 1, 1], [], []>} : vector<8x128xf32>, vector<128x128xf32>, vector<8x128xf32> -> vector<8x128xf32>
    %12 = arith.addf %9, %11 : vector<8x128xf32>
    %c0_9 = arith.constant 0 : index
    %c0_10 = arith.constant 0 : index
    %13 = vector.load %arg9[%c0_9, %c0_10] : memref<8x128xf32, #tpu.memory_space<vmem>>, vector<8x128xf32>
    tpu.vector_store %arg9[%c0_9, %c0_10], %12 {strides = array<i32>} : memref<8x128xf32, #tpu.memory_space<vmem>>, vector<8x128xf32>,
    %c0_i32_11 = arith.constant 0 : i32
    %14 = arith.cmpi eq, %arg1, %c0_i32_11 : i32
    %15 = arith.extui %14 : i1 to i32
    %c0_i32_12 = arith.constant 0 : i32
    %16 = arith.cmpi ne, %15, %c0_i32_12 : i32
    scf.if %16 {
      %c0_15 = arith.constant 0 : index
      %c0_16 = arith.constant 0 : index
      %20 = vector.load %arg10[%c0_15, %c0_16] : memref<8x4xf32, #tpu.memory_space<vmem>>, vector<8x4xf32>
      %c0_17 = arith.constant 0 : index
      %c0_18 = arith.constant 0 : index
      %21 = vector.load %arg6[%c0_17, %c0_18] : memref<128x4xf32, #tpu.memory_space<vmem>>, vector<128x4xf32>
      %cst_19 = arith.constant dense<0.000000e+00> : vector<8x4xf32>
      %22 = tpu.matmul %8, %21, %cst_19 {dimension_numbers = #tpu.dot_dimension_numbers<[1], [0], [0], [1], [0, 0, 1, 1], [], []>} : vector<8x128xf32>, vector<128x4xf32>, vector<8x4xf32> -> vector<8x4xf32>
      %23 = arith.addf %20, %22 : vector<8x4xf32>
      %c0_20 = arith.constant 0 : index
      %c0_21 = arith.constant 0 : index
      %24 = vector.load %arg10[%c0_20, %c0_21] : memref<8x4xf32, #tpu.memory_space<vmem>>, vector<8x4xf32>
      tpu.vector_store %arg10[%c0_20, %c0_21], %23 {strides = array<i32>} : memref<8x4xf32, #tpu.memory_space<vmem>>, vector<8x4xf32>,
    } else {
    }
    %c0_i32_13 = arith.constant 0 : i32
    %17 = arith.cmpi eq, %arg2, %c0_i32_13 : i32
    %18 = arith.extui %17 : i1 to i32
    %c0_i32_14 = arith.constant 0 : i32
    %19 = arith.cmpi ne, %18, %c0_i32_14 : i32
    scf.if %19 {
      %c0_15 = arith.constant 0 : index
      %c0_16 = arith.constant 0 : index
      %20 = vector.load %arg10[%c0_15, %c0_16] : memref<8x4xf32, #tpu.memory_space<vmem>>, vector<8x4xf32>
      %c0_17 = arith.constant 0 : index
      %c0_18 = arith.constant 0 : index
      %21 = vector.load %arg7[%c0_17, %c0_18] : memref<4x128xf32, #tpu.memory_space<vmem>>, vector<4x128xf32>
      %cst_19 = arith.constant dense<0.000000e+00> : vector<8x128xf32>
      %22 = tpu.matmul %20, %21, %cst_19 {dimension_numbers = #tpu.dot_dimension_numbers<[1], [0], [0], [1], [0, 0, 1, 1], [], []>} : vector<8x4xf32>, vector<4x128xf32>, vector<8x128xf32> -> vector<8x128xf32>
      %c0_20 = arith.constant 0 : index
      %c0_21 = arith.constant 0 : index
      %23 = vector.load %arg9[%c0_20, %c0_21] : memref<8x128xf32, #tpu.memory_space<vmem>>, vector<8x128xf32>
      %c0_22 = arith.constant 0 : index
      %c0_23 = arith.constant 0 : index
      %24 = vector.load %arg5[%c0_22, %c0_23] : memref<1x128xf32, #tpu.memory_space<vmem>>, vector<1x128xf32>
      %25 = vector.broadcast %24 : vector<1x128xf32> to vector<8x128xf32>
      %26 = arith.addf %23, %25 : vector<8x128xf32>
      %27 = arith.addf %26, %22 : vector<8x128xf32>
      %c0_24 = arith.constant 0 : index
      %c0_25 = arith.constant 0 : index
      %28 = vector.load %arg8[%c0_24, %c0_25] : memref<8x128xf32, #tpu.memory_space<vmem>>, vector<8x128xf32>
      tpu.vector_store %arg8[%c0_24, %c0_25], %27 {strides = array<i32>} : memref<8x128xf32, #tpu.memory_space<vmem>>, vector<8x128xf32>,
    } else {
    }
    return
  }
  func.func @transform_0(%arg0: i32, %arg1: i32, %arg2: i32) -> (i32, i32) {
    %c0_i32 = arith.constant 0 : i32
    return %arg0, %arg2 : i32, i32
  }
  func.func @transform_1(%arg0: i32, %arg1: i32, %arg2: i32) -> (i32, i32) {
    %c0_i32 = arith.constant 0 : i32
    return %arg2, %arg1 : i32, i32
  }
  func.func @transform_2(%arg0: i32, %arg1: i32, %arg2: i32) -> (i32, i32) {
    %c0_i32 = arith.constant 0 : i32
    %c0_i32_0 = arith.constant 0 : i32
    return %c0_i32, %arg1 : i32, i32
  }
  func.func @transform_3(%arg0: i32, %arg1: i32, %arg2: i32) -> (i32, i32) {
    %c0_i32 = arith.constant 0 : i32
    %c0_i32_0 = arith.constant 0 : i32
    return %arg2, %c0_i32 : i32, i32
  }
  func.func @transform_4(%arg0: i32, %arg1: i32, %arg2: i32) -> (i32, i32) {
    %c0_i32 = arith.constant 0 : i32
    %c0_i32_0 = arith.constant 0 : i32
    return %c0_i32, %arg1 : i32, i32
  }
  func.func @transform_5(%arg0: i32, %arg1: i32, %arg2: i32) -> (i32, i32) {
    %c0_i32 = arith.constant 0 : i32
    return %arg0, %arg1 : i32, i32
  }
}

</mosaic_0001>

<bundles_post_ra>
// kernel: tpu_custom_call.1
= control target key start
LH: loop header
LB: loop body
LE: loop exit
PB: predicated region body
PF: predicated region fallthrough
CT: control target
= control target key end

     0   :  { %10 = vsyncpa [#allocation5], 0  ;;  %s743_s0 = inlined_call_operand.hbm [shape: f32[8,128], index: 0, kind: input, shape index: {}]   ;;  %s744_s1 = inlined_call_operand.vmem [shape: f32[128,128], index: 1, kind: input, shape index: {}]   ;;  %s745_s2 = inlined_call_operand.vmem [shape: f32[1,128], index: 2, kind: input, shape index: {}]   ;;  %s746_s3 = inlined_call_operand.vmem [shape: f32[128,4], index: 3, kind: input, shape index: {}]   ;;  %s747_s4 = inlined_call_operand.vmem [shape: f32[4,128], index: 4, kind: input, shape index: {}]   ;;  %s748_s5 = inlined_call_operand.hbm [shape: f32[8,128], index: 5, kind: output, shape index: {}]  }
   0x1   :  { %11 = vsyncpa [#allocation6], 0  ;;  %s555_s18 = smov [#allocation4]   ;;  %s507_s22 = scalar_lea.hbm %s743_s0, 128 }
   0x2   :  { %s18_s19 = sshll.u32 %s555_s18, 4  ;;  %p508_p0 = scmp.ne.s32.totalorder %s743_s0, %s507_s22  ;;  %s19_s19 = int_to_ptr.vmem [resolvable:$true] %s18_s19 }
   0x3   :  { %p511_p1 = scmp.lt.u32.totalorder %s507_s22, %s743_s0 }
   0x5   :  { %p513_p2 = pnand %p511_p1, %p508_p0 }
   0x7   :  { %516 = shalt.err (!%p513_p2)
}
   0x8   :  { %s517_s27 = scalar_lea.vmem %s19_s19, 128  ;;  %p522_p4 = scmp.lt.s32.totalorder %s19_s19, %s19_s19 }
   0x9   :  { %p518_p3 = scmp.ne.s32.totalorder %s19_s19, %s517_s27  ;;  %p523_p5 = scmp.lt.s32.totalorder %s517_s27, %s517_s27 }
   0xb   :  { %p524_p6 = por %p523_p5, %p522_p4 }
   0xd   :  { %p525_p7 = pnand %p524_p6, %p518_p3 }
   0xf   :  { %528 = shalt.err (!%p525_p7)
}
  0x10   :  { %21 = dma.hbm_to_vmem [thread:$0]  %s743_s0, 128, %s19_s19, [#allocation5]  }
  0x11   :  { %551 = dma.done.wait [#allocation5], 128  }
  0x12   :  { %552 = vsyncadd [#allocation5], 4294967168  ;;  %vm43_vm0 = vcmask 31744   ;;  %v556_v0 = vmov 0.0|0.0   ;;  %vm557_vm1 = vmmov 0   ;;  %v558_v1 = vmov 0.0  }
  0x13   :  { %475 = vmatprep.subr.bf16.mxu1 %v556_v0  ;;  %443 = vmatprep.mubr.msk.f32.mxu1 %vm557_vm1, %v558_v1  ;;  %44 = vst.msk [vmem:[#allocation3] sm:$0xff] %vm43_vm0, %v558_v1  ;;  %v139_v2 = vld [vmem:[%s746_s3] sm:$0xff]  ;;  %v140_v3 = vld [vmem:[%s746_s3 + $0x8] sm:$0xff]  ;;  %v141_v4 = vld [vmem:[%s746_s3 + $0x10] sm:$0xff]  ;;  %vm237_vm2 = vcmask 1043456   ;;  %s559_s18 = smov [#allocation7]  }
  0x14   :  { %451 = vmatprep.subr.bf16.mxu0 %v556_v0  ;;  %408 = vmatprep.mubr.msk.f32.mxu0 %vm557_vm1, %v558_v1  ;;  %v476_v5 = vpack.c.bf16 %v140_v3, %v139_v2  ;;  %v142_v6 = vld [vmem:[%s746_s3 + $0x18] sm:$0xff]  ;;  %v143_v8 = vld [vmem:[%s746_s3 + $0x20] sm:$0xff]  ;;  %v144_v9 = vld [vmem:[%s746_s3 + $0x28] sm:$0xff]  ;;  %s328_s19 = sshll.u32 %s559_s18, 4  ;;  %s329_s19 = int_to_ptr.vmem [resolvable:$true] %s328_s19 }
  0x15   :  { %v479_v7 = vpack.c.bf16 %v142_v6, %v141_v4  ;;  %v47_v10 = vld [vmem:[%s744_s1] sm:$0xff]  ;;  %v48_v11 = vld [vmem:[%s744_s1 + $0x8] sm:$0xff]  ;;  %v49_v12 = vld [vmem:[%s744_s1 + $0x10] sm:$0xff]  ;;  %v482_v14 = vpack.c.bf16 %v144_v9, %v143_v8  ;;  %p534_p9 = scmp.lt.s32.totalorder %s329_s19, %s329_s19 }
  0x16   :  { %477 = vmatpush3.bf16.msra.mxu1 %v476_v5  ;;  %v50_v13 = vld [vmem:[%s744_s1 + $0x18] sm:$0xff]  ;;  %v452_v15 = vpack.c.bf16 %v48_v11, %v47_v10  ;;  %v145_v16 = vld [vmem:[%s746_s3 + $0x30] sm:$0xff]  ;;  %v51_v19 = vld [vmem:[%s744_s1 + $0x20] sm:$0xff] }
  0x17   :  { %478 = vmatprep.subr.bf16.mxu1 %v556_v0  ;;  %v146_v17 = vld [vmem:[%s746_s3 + $0x38] sm:$0xff]  ;;  %v455_v18 = vpack.c.bf16 %v50_v13, %v49_v12  ;;  %v52_v20 = vld [vmem:[%s744_s1 + $0x28] sm:$0xff]  ;;  %v147_v22 = vld [vmem:[%s746_s3 + $0x40] sm:$0xff] }
  0x18   :  { %453 = vmatpush3.bf16.msra.mxu0 %v452_v15  ;;  %v485_v21 = vpack.c.bf16 %v146_v17, %v145_v16  ;;  %v148_v23 = vld [vmem:[%s746_s3 + $0x48] sm:$0xff]  ;;  %v458_v24 = vpack.c.bf16 %v52_v20, %v51_v19  ;;  %v53_v25 = vld [vmem:[%s744_s1 + $0x30] sm:$0xff]  ;;  %v54_v26 = vld [vmem:[%s744_s1 + $0x38] sm:$0xff] }
  0x19   :  { %454 = vmatprep.subr.bf16.mxu0 %v556_v0  ;;  %v488_v27 = vpack.c.bf16 %v148_v23, %v147_v22  ;;  %v149_v28 = vld [vmem:[%s746_s3 + $0x50] sm:$0xff]  ;;  %v150_v29 = vld [vmem:[%s746_s3 + $0x58] sm:$0xff]  ;;  %v461_v30 = vpack.c.bf16 %v54_v26, %v53_v25  ;;  %v55_v31 = vld [vmem:[%s744_s1 + $0x40] sm:$0xff] }
  0x1a   :  { %480 = vmatpush3.bf16.msra.mxu1 %v479_v7  ;;  %v56_v32 = vld [vmem:[%s744_s1 + $0x48] sm:$0xff]  ;;  %v491_v33 = vpack.c.bf16 %v150_v29, %v149_v28  ;;  %v151_v34 = vld [vmem:[%s746_s3 + $0x60] sm:$0xff]  ;;  %v57_v37 = vld [vmem:[%s744_s1 + $0x50] sm:$0xff] }
  0x1b   :  { %481 = vmatprep.subr.bf16.mxu1 %v556_v0  ;;  %v152_v35 = vld [vmem:[%s746_s3 + $0x68] sm:$0xff]  ;;  %v464_v36 = vpack.c.bf16 %v56_v32, %v55_v31  ;;  %v58_v38 = vld [vmem:[%s744_s1 + $0x58] sm:$0xff]  ;;  %v153_v40 = vld [vmem:[%s746_s3 + $0x70] sm:$0xff] }
  0x1c   :  { %456 = vmatpush3.bf16.msra.mxu0 %v455_v18  ;;  %v494_v39 = vpack.c.bf16 %v152_v35, %v151_v34  ;;  %v154_v41 = vld [vmem:[%s746_s3 + $0x78] sm:$0xff]  ;;  %v467_v42 = vpack.c.bf16 %v58_v38, %v57_v37  ;;  %v59_v43 = vld [vmem:[%s744_s1 + $0x60] sm:$0xff]  ;;  %v60_v44 = vld [vmem:[%s744_s1 + $0x68] sm:$0xff] }
  0x1d   :  { %457 = vmatprep.subr.bf16.mxu0 %v556_v0  ;;  %v497_v45 = vpack.c.bf16 %v154_v41, %v153_v40  ;;  %v470_v46 = vpack.c.bf16 %v60_v44, %v59_v43  ;;  %v61_v47 = vld [vmem:[%s744_s1 + $0x70] sm:$0xff]  ;;  %v62_v48 = vld [vmem:[%s744_s1 + $0x78] sm:$0xff]  ;;  %v45_v49 = vld [vmem:[#allocation4] sm:$0xff] }
  0x1e   :  { %483 = vmatpush3.bf16.msra.mxu1 %v482_v14  ;;  %v473_v50 = vpack.c.bf16 %v62_v48, %v61_v47  ;;  %v232_v51 = vld [vmem:[%s747_s4] sm:$0xf]  ;;  %s529_s4 = scalar_lea.vmem %s329_s19, 128 }
  0x1f   :  { %484 = vmatprep.subr.bf16.mxu1 %v556_v0  ;;  %v138_v52 = vld [vmem:[#allocation3] sm:$0xff]  ;;  %p530_p8 = scmp.ne.s32.totalorder %s329_s19, %s529_s4  ;;  %p535_p10 = scmp.lt.s32.totalorder %s529_s4, %s529_s4 }
  0x20   :  { %459 = vmatpush3.bf16.msra.mxu0 %v458_v24  ;;  %v339_v57 = vld [vmem:[%s745_s2] ss:$0 sm:$0xff] }
  0x21   :  { %460 = vmatprep.subr.bf16.mxu0 %v556_v0  ;;  %p536_p11 = por %p535_p10, %p534_p9 }
  0x22   :  { %486 = vmatpush3.bf16.msra.mxu1 %v485_v21 }
  0x23   :  { %487 = vmatprep.subr.bf16.mxu1 %v556_v0  ;;  %p537_p12 = pnand %p536_p11, %p530_p8 }
  0x24   :  { %462 = vmatpush3.bf16.msra.mxu0 %v461_v30 }
  0x25   :  { %463 = vmatprep.subr.bf16.mxu0 %v556_v0 }
  0x26   :  { %489 = vmatpush3.bf16.msra.mxu1 %v488_v27 }
  0x27   :  { %490 = vmatprep.subr.bf16.mxu1 %v556_v0 }
  0x28   :  { %465 = vmatpush3.bf16.msra.mxu0 %v464_v36 }
  0x29   :  { %466 = vmatprep.subr.bf16.mxu0 %v556_v0 }
  0x2a   :  { %492 = vmatpush3.bf16.msra.mxu1 %v491_v33 }
  0x2b   :  { %493 = vmatprep.subr.bf16.mxu1 %v556_v0 }
  0x2c   :  { %468 = vmatpush3.bf16.msra.mxu0 %v467_v42 }
  0x2d   :  { %469 = vmatprep.subr.bf16.mxu0 %v556_v0 }
  0x2e   :  { %495 = vmatpush3.bf16.msra.mxu1 %v494_v39 }
  0x2f   :  { %496 = vmatprep.subr.bf16.mxu1 %v556_v0 }
  0x30   :  { %471 = vmatpush3.bf16.msra.mxu0 %v470_v46 }
  0x31   :  { %472 = vmatprep.subr.bf16.mxu0 %v556_v0 }
  0x32   :  { %498 = vmatpush3.bf16.msra.mxu1 %v497_v45 }
  0x34   :  { %474 = vmatpush3.bf16.msra.mxu0 %v473_v50 }
  0x35   :  { %444 = vmatmul.mubr.f32.vlgmr.msra.gmra.mrb[0].mxu1 %v45_v49  ;;  %446 = vmatprep.subr.mxu0 %v558_v1 }
  0x37   :  { %409 = vmatmul.mubr.f32.vlgmr.msra.gmra.mrb[0].mxu0 %v45_v49 }
  0x38   :  { %448 = vmatprep.mubr.msk.f32.mxu0 %vm557_vm1, %v558_v1  ;;  %447 = vmatpush3.msk.msra.mxu0 %vm237_vm2, %v232_v51 }
 0x108   :  { %v221_v53 = vpop.f32.mrb[0].mxu1 }
 0x109   :  { %v225_v54 = vadd.f32 %v221_v53, %v138_v52  ;;  %v445_v55 = vpop.f32.mrb[1].mxu1 }
 0x10b   :  { %227 = vst.msk [vmem:[#allocation3] sm:$0xff] %vm43_vm0, %v225_v54 }
 0x112   :  { %v231_v56 = vld [vmem:[#allocation3] sm:$0xff] }
 0x113   :  { %449 = vmatmul.mubr.msk.f32.vlgmr.msra.gmra.mrb[0].mxu0 %vm43_vm0, %v231_v56 }
 0x1e6   :  { %v307_v58 = vpop.f32.mrb[0].mxu0 }
 0x1e7   :  { %v499_v59 = vadd.f32 %v339_v57, %v307_v58  ;;  %v450_v60 = vpop.f32.mrb[1].mxu0 }
 0x1e9   :  { %321 = vst [vmem:[#allocation7] sm:$0xff] %v499_v59 }
 0x1ea   :  { %540 = shalt.err (!%p537_p12)
}
 0x1eb   :  { %s541_s22 = scalar_lea.hbm %s748_s5, 128 }
 0x1ec   :  { %p542_p13 = scmp.ne.s32.totalorder %s748_s5, %s541_s22  ;;  %p545_p0 = scmp.lt.u32.totalorder %s541_s22, %s748_s5 }
 0x1ee   :  { %p547_p1 = pnand %p545_p0, %p542_p13 }
 0x1f0   :  { %550 = shalt.err (!%p547_p1)
}
 0x1f1   :  { %331 = dma.vmem_to_hbm [thread:$0]  %s329_s19, 128, %s748_s5, [#allocation6]  }
 0x1f2   :  { %553 = dma.done.wait [#allocation6], 128  }
 0x1f3   :  { %554 = vsyncadd [#allocation6], 4294967168 }
 0x1f4   :  { %335 = vsyncpa [#allocation5], 1 }
 0x1f5   :  { %336 = vsyncpa [#allocation6], 1 }

</bundles_post_ra>
